<compile_context>
chip_gen: v7x
topology: tpu7x:2x2x1
jax: 0.10.0
libtpu: 0.0.40
codegen_flags: <defaults>
</compile_context>

<pallas_src>
import jax
import jax.numpy as jnp
from jax import lax
from jax.experimental import pallas as pl
from jax.experimental.pallas import tpu as pltpu


_CHUNK = 512            # pixels per register-resident inner chunk (multiple of 128)
_TARGET_TILE = 65536    # pixels per grid step (amortizes per-step overhead)
_MIN_GRID_STEPS = 4     # keep both v7x TensorCores fed


def _cdiv(a, b):
    return -(-a // b)


# ---------------------------------------------------------------------------
# Pallas kernel: per-pixel MLP seg head, pixels on the lane axis.
#   x_ref:   (C_in, T)        f32 pixel tile (T = HW tile, multiple of _CHUNK)
#   w1t_ref: (HIDDEN, C_in)   bf16, VMEM-resident (constant index_map)
#   b1_ref:  (HIDDEN, 1)      f32
#   w2t_ref: (K, HIDDEN)      bf16
#   b2_ref:  (K, 1)           f32
#   o_ref:   (K, T)           bf16, lane-dense -> unmasked vst
# ---------------------------------------------------------------------------
def _seg_head_kernel(x_ref, w1t_ref, b1_ref, w2t_ref, b2_ref, o_ref):
    w1t = w1t_ref[...]          # (HIDDEN, C_in) bf16
    b1 = b1_ref[...]            # (HIDDEN, 1)    f32
    w2t = w2t_ref[...]          # (K, HIDDEN)    bf16
    b2 = b2_ref[...]            # (K, 1)         f32

    tile = o_ref.shape[-1]
    n_chunks = tile // _CHUNK   # static: tile is always a multiple of _CHUNK

    def body(i, carry):
        start = pl.multiple_of(i * _CHUNK, _CHUNK)
        # Per-chunk f32 load + in-register bf16 cast (no whole-tile bf16 copy in VMEM).
        x_bf = x_ref[:, pl.ds(start, _CHUNK)].astype(jnp.bfloat16)      # (C_in, CHUNK)
        h = jnp.dot(w1t, x_bf, preferred_element_type=jnp.float32)      # (HIDDEN, CHUNK) regs
        h = jnp.maximum(h + b1, 0.0).astype(jnp.bfloat16)
        out = jnp.dot(w2t, h, preferred_element_type=jnp.float32)       # (K, CHUNK)
        # Only VMEM store in the loop: lane-dense bf16 output chunk.
        o_ref[:, pl.ds(start, _CHUNK)] = (out + b2).astype(o_ref.dtype)
        return carry

    if n_chunks == 1:
        body(0, 0)
    else:
        # Partial unroll gives the LLO scheduler room to overlap vld / MXU / vst.
        lax.fori_loop(0, n_chunks, body, 0, unroll=min(n_chunks, 8))


def seg_head_pallas(x_nchw, w1t, b1, w2t, b2):
    """x_nchw: (N, C, HW) f32. Returns (N, K, HW) in bfloat16."""
    n, c_in, hw = x_nchw.shape
    hidden = w1t.shape[0]
    n_classes = w2t.shape[0]

    # --- Tile selection (static Python ints) ---------------------------------
    hw_chunks = _cdiv(hw, _CHUNK)
    tile_chunks = min(_TARGET_TILE // _CHUNK, hw_chunks)
    # Ensure enough grid steps to feed both v7x TensorCores (when splittable).
    while tile_chunks > 1 and n * _cdiv(hw_chunks, tile_chunks) < _MIN_GRID_STEPS:
        tile_chunks = _cdiv(tile_chunks, 2)
    tile_hw = tile_chunks * _CHUNK

    # --- Pad HW up to a multiple of the tile (zero pad, sliced off after) ----
    hw_pad = _cdiv(hw, tile_hw) * tile_hw
    if hw_pad != hw:
        x_nchw = jnp.pad(x_nchw, ((0, 0), (0, 0), (0, hw_pad - hw)))

    grid = (n, hw_pad // tile_hw)

    out = pl.pallas_call(
        _seg_head_kernel,
        out_shape=jax.ShapeDtypeStruct((n, n_classes, hw_pad), jnp.bfloat16),
        grid_spec=pltpu.PrefetchScalarGridSpec(
            num_scalar_prefetch=0,
            grid=grid,
            in_specs=[
                # Streaming pixel tile: batch dim squeezed, pixels on lanes.
                pl.BlockSpec((None, c_in, tile_hw), lambda b, t: (b, 0, t)),
                # Weights / biases: constant index_map -> VMEM-resident, no per-step DMA.
                pl.BlockSpec((hidden, c_in), lambda b, t: (0, 0)),
                pl.BlockSpec((hidden, 1), lambda b, t: (0, 0)),
                pl.BlockSpec((n_classes, hidden), lambda b, t: (0, 0)),
                pl.BlockSpec((n_classes, 1), lambda b, t: (0, 0)),
            ],
            out_specs=pl.BlockSpec((None, n_classes, tile_hw), lambda b, t: (b, 0, t)),
        ),
        compiler_params=pltpu.CompilerParams(
            dimension_semantics=("parallel", "parallel"),
            vmem_limit_bytes=32 * 1024 * 1024,  # covers 2x(f32 in + bf16 out) tiles w/ margin
        ),
    )(x_nchw, w1t, b1, w2t, b2)

    if hw_pad != hw:
        out = out[:, :, :hw]
    return out


# ---------------------------------------------------------------------------
# ToySegModel: takes a "data sample" (dict), reads .image, writes .pred_sem_seg
# ---------------------------------------------------------------------------
class ToySegModel:
    def __init__(self, c_in=4, hidden=32, n_classes=8):
        k1, k2 = jax.random.split(jax.random.PRNGKey(42))
        w1 = jax.random.normal(k1, (c_in, hidden), jnp.float32) * 0.1
        w2 = jax.random.normal(k2, (hidden, n_classes), jnp.float32) * 0.1
        # Pre-transposed bf16 weights (pixels-on-lane layout), f32 column biases.
        self.w1t = jnp.transpose(w1).astype(jnp.bfloat16)      # (hidden, c_in)
        self.b1 = jnp.zeros((hidden, 1), jnp.float32)
        self.w2t = jnp.transpose(w2).astype(jnp.bfloat16)      # (n_classes, hidden)
        self.b2 = jnp.zeros((hidden and n_classes, 1), jnp.float32)
        self.n_classes = n_classes

    def __call__(self, sample):
        image = sample["image"]                  # NCHW: (N, C, H, W)
        n, c, h, w = image.shape
        # NCHW-native: contiguous view (N, C, H*W) — no transpose, no extra HBM pass.
        # TODO(synk): if the producer can supply bf16 images, pass them through
        # directly (drops HBM input stream 16 -> 8 B/pixel in this mem-bound kernel).
        x = image.reshape(n, c, h * w)
        logits = seg_head_pallas(x, self.w1t, self.b1, self.w2t, self.b2)
        sample = dict(sample)
        sample["pred_sem_seg"] = logits.reshape(n, self.n_classes, h, w)  # bf16
        return sample


# ---------------------------------------------------------------------------
# ModelTracingWrapper: tensor(s) in -> tensor(s) out
# ---------------------------------------------------------------------------
class ModelTracingWrapper:
    # TODO(synk): torch.jit.trace / TorchScript export itself has no JAX/Pallas
    # equivalent; only the traced forward compute is implemented here.
    def __init__(self, model, input_to_sample, sample_to_output):
        self.model = model
        self.input_to_sample = input_to_sample
        self.sample_to_output = sample_to_output

    def __call__(self, *args, **kwargs):
        sample_input = self.input_to_sample(*args, **kwargs)
        sample_output = self.model(sample_input)
        tuple_output = self.sample_to_output(sample_output)
        return tuple_output


if __name__ == "__main__":
    # Small shapes consistent with the docstring example (N, C, H, W).
    N, C, H, W = 2, 4, 16, 16
    x = jax.random.normal(jax.random.PRNGKey(0), (N, C, H, W), jnp.float32)

    seg_model = ToySegModel(c_in=C, hidden=32, n_classes=8)
    traceable_model = ModelTracingWrapper(
        seg_model,
        lambda image: {"image": image},          # input_to_sample
        lambda sample: sample["pred_sem_seg"],   # sample_to_output
    )

    pred_sem_seg = traceable_model(x)
    pred_sem_seg = jax.block_until_ready(pred_sem_seg)
    assert pred_sem_seg.shape == (N, 8, H, W)
    assert pred_sem_seg.dtype == jnp.bfloat16

    # Pure-JAX reference (same bf16-rounded weights AND bf16-rounded input, f32 math).
    w1f = seg_model.w1t.astype(jnp.float32).T    # (C, hidden)
    w2f = seg_model.w2t.astype(jnp.float32).T    # (hidden, K)
    xf = jnp.transpose(x, (0, 2, 3, 1)).reshape(N * H * W, C)
    xf = xf.astype(jnp.bfloat16).astype(jnp.float32)   # mirror in-kernel input cast
    ref = jnp.maximum(xf @ w1f + seg_model.b1.T, 0.0) @ w2f + seg_model.b2.T
    ref = jnp.transpose(ref.reshape(N, H, W, 8), (0, 3, 1, 2))
    # bf16 intermediates/output: ~3 significant digits on logits (intentional
    # precision choice; fine for segmentation argmax).
    assert jnp.allclose(pred_sem_seg.astype(jnp.float32), ref, atol=2e-2, rtol=2e-2)

    print("KERNEL_OK")
</pallas_src>

<mosaic_0001>
module attributes {stable_mosaic.version = 11 : i64} {
  func.func @_seg_head_kernel(%arg0: i32, %arg1: i32, %arg2: memref<1x4x512xf32, #tpu.memory_space<vmem>>, %arg3: memref<32x4xbf16, #tpu.memory_space<vmem>>, %arg4: memref<32x1xf32, #tpu.memory_space<vmem>>, %arg5: memref<8x32xbf16, #tpu.memory_space<vmem>>, %arg6: memref<8x1xf32, #tpu.memory_space<vmem>>, %arg7: memref<1x8x512xbf16, #tpu.memory_space<vmem>>) attributes {dimension_semantics = [#tpu.dimension_semantics<parallel>, #tpu.dimension_semantics<parallel>], iteration_bounds = array<i64: 2, 1>, scalar_prefetch = 0 : i64, scratch_operands = 0 : i64, tpu.core_type = #tpu.core_type<tc>, window_params = [{transform_indices = @transform_0, window_bounds = array<i64: 1, 4, 512>}, {pipeline_mode = #tpu.pipeline_mode<synchronous>, transform_indices = @transform_1, window_bounds = array<i64: 32, 4>}, {pipeline_mode = #tpu.pipeline_mode<synchronous>, transform_indices = @transform_2, window_bounds = array<i64: 32, 1>}, {pipeline_mode = #tpu.pipeline_mode<synchronous>, transform_indices = @transform_3, window_bounds = array<i64: 8, 32>}, {pipeline_mode = #tpu.pipeline_mode<synchronous>, transform_indices = @transform_4, window_bounds = array<i64: 8, 1>}, {transform_indices = @transform_5, window_bounds = array<i64: 1, 8, 512>}]} {
    %c0 = arith.constant 0 : index
    %c0_0 = arith.constant 0 : index
    %0 = vector.load %arg3[%c0, %c0_0] : memref<32x4xbf16, #tpu.memory_space<vmem>>, vector<32x4xbf16>
    %c0_1 = arith.constant 0 : index
    %c0_2 = arith.constant 0 : index
    %1 = vector.load %arg4[%c0_1, %c0_2] : memref<32x1xf32, #tpu.memory_space<vmem>>, vector<32x1xf32>
    %c0_3 = arith.constant 0 : index
    %c0_4 = arith.constant 0 : index
    %2 = vector.load %arg5[%c0_3, %c0_4] : memref<8x32xbf16, #tpu.memory_space<vmem>>, vector<8x32xbf16>
    %c0_5 = arith.constant 0 : index
    %c0_6 = arith.constant 0 : index
    %3 = vector.load %arg6[%c0_5, %c0_6] : memref<8x1xf32, #tpu.memory_space<vmem>>, vector<8x1xf32>
    %c0_i32 = arith.constant 0 : i32
    %4 = tpu.assume_multiple %c0_i32, 512 : i32
    %c0_7 = arith.constant 0 : index
    %c0_8 = arith.constant 0 : index
    %5 = arith.index_cast %4 : i32 to index
    %6 = vector.load %arg2[%c0_7, %c0_8, %5] : memref<1x4x512xf32, #tpu.memory_space<vmem>>, vector<1x4x512xf32>
    %7 = vector.shape_cast %6 : vector<1x4x512xf32> to vector<4x512xf32>
    %8 = arith.truncf %7 : vector<4x512xf32> to vector<4x512xbf16>
    %cst = arith.constant dense<0.000000e+00> : vector<32x512xf32>
    %9 = tpu.matmul %0, %8, %cst {dimension_numbers = #tpu.dot_dimension_numbers<[1], [0], [0], [1], [0, 0, 1, 1], [], []>} : vector<32x4xbf16>, vector<4x512xbf16>, vector<32x512xf32> -> vector<32x512xf32>
    %10 = vector.broadcast %1 : vector<32x1xf32> to vector<32x512xf32>
    %11 = arith.addf %9, %10 : vector<32x512xf32>
    %cst_9 = arith.constant 0.000000e+00 : f32
    %12 = vector.broadcast %cst_9 : f32 to vector<32x512xf32>
    %13 = arith.maximumf %11, %12 : vector<32x512xf32>
    %14 = arith.truncf %13 : vector<32x512xf32> to vector<32x512xbf16>
    %cst_10 = arith.constant dense<0.000000e+00> : vector<8x512xf32>
    %15 = tpu.matmul %2, %14, %cst_10 {dimension_numbers = #tpu.dot_dimension_numbers<[1], [0], [0], [1], [0, 0, 1, 1], [], []>} : vector<8x32xbf16>, vector<32x512xbf16>, vector<8x512xf32> -> vector<8x512xf32>
    %16 = vector.broadcast %3 : vector<8x1xf32> to vector<8x512xf32>
    %17 = arith.addf %15, %16 : vector<8x512xf32>
    %18 = arith.truncf %17 : vector<8x512xf32> to vector<8x512xbf16>
    %c0_11 = arith.constant 0 : index
    %c0_12 = arith.constant 0 : index
    %19 = arith.index_cast %4 : i32 to index
    %20 = vector.load %arg7[%c0_11, %c0_12, %19] : memref<1x8x512xbf16, #tpu.memory_space<vmem>>, vector<1x8x512xbf16>
    %21 = vector.shape_cast %20 : vector<1x8x512xbf16> to vector<8x512xbf16>
    %22 = vector.shape_cast %18 : vector<8x512xbf16> to vector<1x8x512xbf16>
    tpu.vector_store %arg7[%c0_11, %c0_12, %19], %22 {strides = array<i32>} : memref<1x8x512xbf16, #tpu.memory_space<vmem>>, vector<1x8x512xbf16>,
    return
  }
  func.func @transform_0(%arg0: i32, %arg1: i32) -> (i32, i32, i32) {
    %c0_i32 = arith.constant 0 : i32
    %c0_i32_0 = arith.constant 0 : i32
    return %arg0, %c0_i32, %arg1 : i32, i32, i32
  }
  func.func @transform_1(%arg0: i32, %arg1: i32) -> (i32, i32) {
    %c0_i32 = arith.constant 0 : i32
    %c0_i32_0 = arith.constant 0 : i32
    %c0_i32_1 = arith.constant 0 : i32
    return %c0_i32, %c0_i32_0 : i32, i32
  }
  func.func @transform_2(%arg0: i32, %arg1: i32) -> (i32, i32) {
    %c0_i32 = arith.constant 0 : i32
    %c0_i32_0 = arith.constant 0 : i32
    %c0_i32_1 = arith.constant 0 : i32
    return %c0_i32, %c0_i32_0 : i32, i32
  }
  func.func @transform_3(%arg0: i32, %arg1: i32) -> (i32, i32) {
    %c0_i32 = arith.constant 0 : i32
    %c0_i32_0 = arith.constant 0 : i32
    %c0_i32_1 = arith.constant 0 : i32
    return %c0_i32, %c0_i32_0 : i32, i32
  }
  func.func @transform_4(%arg0: i32, %arg1: i32) -> (i32, i32) {
    %c0_i32 = arith.constant 0 : i32
    %c0_i32_0 = arith.constant 0 : i32
    %c0_i32_1 = arith.constant 0 : i32
    return %c0_i32, %c0_i32_0 : i32, i32
  }
  func.func @transform_5(%arg0: i32, %arg1: i32) -> (i32, i32, i32) {
    %c0_i32 = arith.constant 0 : i32
    %c0_i32_0 = arith.constant 0 : i32
    return %arg0, %c0_i32, %arg1 : i32, i32, i32
  }
}

</mosaic_0001>

<bundles_post_ra>
// kernel: tpu_custom_call.1
= control target key start
LH: loop header
LB: loop body
LE: loop exit
PB: predicated region body
PF: predicated region fallthrough
CT: control target
= control target key end

     0   :  { %10 = vsyncpa [#allocation3], 0  ;;  %s998_s0 = inlined_call_operand.vmem [shape: f32[2,4,512], index: 0, kind: input, shape index: {}]   ;;  %s999_s1 = inlined_call_operand.vmem [shape: bf16[32,4], index: 1, kind: input, shape index: {}]   ;;  %s1000_s2 = inlined_call_operand.vmem [shape: f32[32,1], index: 2, kind: input, shape index: {}]   ;;  %s1001_s3 = inlined_call_operand.vmem [shape: bf16[8,32], index: 3, kind: input, shape index: {}]   ;;  %s1002_s4 = inlined_call_operand.vmem [shape: f32[8,1], index: 4, kind: input, shape index: {}]   ;;  %s1003_s5 = inlined_call_operand.hbm [shape: bf16[2,8,512], index: 5, kind: output, shape index: {}]  }
   0x1   :  { %12 = vsyncpa [#allocation3 + $0x1], 0  ;;  %s862_s18 = smov 0   ;;  %s864_s19 = smov 0  }
   0x2   :  { %s866_s20 = smov 0   ;;  %s868_s21 = smov 0  }
   0x3   :  { %s870_s22 = smov 0   ;;  %s872_s23 = smov 0  }
   0x4 LB: > { %s659_s24 = sadd.s32 4294967295, %s828_s23   ;;  %s660_s25 = sadd.s32 4294967294, %s828_s23   ;;  %s828_s23 = sphi %s872_s23, %s18_s23   ;;  %s824_s22 = sphi %s870_s22, %s1010_s22   ;;  %s820_s21 = sphi %s868_s21, %s1009_s21   ;;  %s816_s20 = sphi %s866_s20, %s1008_s20   ;;  %s812_s19 = sphi %s864_s19, %s1007_s19   ;;  %s808_s18 = sphi %s862_s18, %s1006_s18  }
   0x5   : > { %s30_s26 = sadd.s32 1, %s824_s22  ;;  %s151_s27 = sadd.s32 1, %s816_s20 }
   0x6   : > { %p32_p0 = scmp.ge.s32.totalorder %s30_s26, 2  ;;  %p161_p1 = scmp.ne.s32.totalorder %s816_s20, %s812_s19 }
   0x7   : > { %p162_p2 = scmp.eq.s32.totalorder %s659_s24, 1  ;;  %p167_p3 = scmp.ne.s32.totalorder %s812_s19, %s808_s18 }
   0x8   : > { %s1012_s26 = smov (%p32_p0, %s30_s26), 0  ;;  %p168_p5 = scmp.eq.s32.totalorder %s660_s25, 1 }
   0x9   : > { %p902_p4 = por %p162_p2, %p161_p1  ;;  %s146_s29 = ssub.s32 %s824_s22, %s1012_s26 }
   0xa   : > { %p663_p6 = scmp.ge.s32.totalorder %s828_s23, 1  ;;  %p149_p7 = scmp.eq.s32.totalorder %s146_s29, 0 }
   0xb   : > { %p909_p8 = por %p168_p5, %p167_p3  ;;  %p211_p9 = scmp.lt.s32.totalorder %s828_s23, 3 }
   0xc   : > { %s915_s6 = scalar_select %p149_p7, %s816_s20, %s151_s27  }
   0xd   : > { %p212_p10 = pnand %p663_p6, %p211_p9 }
   0xe   : > { %p244_p11 = scmp.lt.s32.totalorder (!%p212_p10), %s820_s21, 1  ;;  %v830_v0 = vmov (!%p212_p10), 0   ;;  %v259_v1 = vld [vmem:[%s1000_s2] sm:$0xff] (!%p212_p10)  ;;  %v261_v2 = vld [vmem:[%s1000_s2 + $0x10] sm:$0xff] (!%p212_p10)  ;;  %v260_v3 = vld [vmem:[%s1000_s2 + $0x8] sm:$0xff] (!%p212_p10)  ;;  %vm314_vm0 = vcmask (!%p212_p10), 1041408  }
   0xf   : > { %215 = sbr.rel (%p212_p10) target bundleno = 499 (0x1f3), region = 40  ;;  %359 = vmatprep.mubr.bf16.mxu0 (!%p212_p10), %v830_v0  ;;  %412 = vmatprep.mubr.bf16.mxu1 (!%p212_p10), %v830_v0  ;;  %v262_v4 = vld [vmem:[%s1000_s2 + $0x18] sm:$0xff] (!%p212_p10)  ;;  %v264_v15 = vld [vmem:[%s1002_s4] sm:$0xff] (!%p212_p10)  ;;  %vm307_vm1 = vcmask (!%p212_p10), 31744   ;;  %v749_v17 = vld [vmem:[%s999_s1 + $0x8] sm:$0xff] (!%p212_p10)   ;;  %vm462_vm2 = vcmask (!%p212_p10), 261120  }
  0x10   : > { %744 = vset.pattern.permute.xlu0 (!%p212_p10), %v830_v0  ;;  %745 = vset.pattern.permute.xlu1 (!%p212_p10), %v830_v0  ;;  %v748_v16 = vld [vmem:[%s999_s1] sm:$0xff] (!%p212_p10)   ;;  %s240_s13 = sand.u32 (!%p212_p10), 1, %s812_s19   ;;  %s687_s15 = sshll.u32 (!%p212_p10), %s820_s21, 8 }
  0x11   : > { %279 = vperm.xlu0 (!%p212_p10), %744, %v259_v1   ;;  %289 = vperm.xlu1 (!%p212_p10), %745, %v261_v2   ;;  %s664_s14 = sshll.u32 (!%p212_p10), %s240_s13, 4  ;;  %s951_s27 = scalar_lea.hbm (!%p212_p10), %s1003_s5, %s687_s15 }
  0x12   : > { %s242_s16 = scalar_lea.vmem (!%p212_p10), [#allocation2], %s664_s14 }
  0x15   : > { %284 = vperm.xlu0 (!%p212_p10), %744, %v260_v3   ;;  %294 = vperm.xlu1 (!%p212_p10), %745, %v262_v4  }
  0x16   : > { %s245_s7 = scalar_select %p244_p11, %s820_s21, 1 }
  0x17   : > { %s567_s21 = scalar_lea.sflag [#allocation3], %s240_s13 }
  0x18   : > { %s684_s12 = sshll.u32 %s245_s7, 4  ;;  %s831_s7 = smov [#allocation2]  }
  0x19   : > { %s251_s17 = scalar_lea.vmem %s998_s0, %s684_s12  ;;  %459 = vperm.xlu0 %744, %v264_v15   ;;  %s754_s8 = sshll.u32 %s831_s7, 4  ;;  %s755_s8 = int_to_ptr.vmem [resolvable:$false] %s754_s8 }
  0x1a   : > { %v265_v5 = vld [vmem:[%s251_s17] sm:$0xff]  ;;  %v266_v6 = vld [vmem:[%s251_s17 + $0x8] sm:$0xff]  ;;  %s583_s17 = sshll.u32 %s242_s16, 4  ;;  %s756_s9 = scalar_lea.vmem %s755_s8, 512  ;;  %s953_s17 = int_to_ptr.vmem [resolvable:$true] %s583_s17 }
  0x1b   : > { %v269_v7 = vcombine.high %v265_v5, %v265_v5  ;;  %v270_v8 = vcombine.high %v266_v6, %v266_v6  ;;  %v273_v9 = vpack.c.bf16 %v265_v5, %v265_v5  ;;  %v275_v10 = vpack.c.bf16 %v266_v6, %v266_v6  ;;  %s750_s29 = scalar_lea.vmem %s953_s17, 256  ;;  %p757_p1 = scmp.lt.s32.totalorder %s953_s17, %s755_s8 }
  0x1c   : > { %p751_p12 = scmp.ne.s32.totalorder %s953_s17, %s750_s29  ;;  %p758_p2 = scmp.lt.s32.totalorder %s756_s9, %s750_s29 }
  0x1d   : > { %v274_v11 = vpack.c.bf16 %v269_v7, %v269_v7  ;;  %v276_v12 = vpack.c.bf16 %v270_v8, %v270_v8  ;;  %v316_v13 = vsel %vm314_vm0, %v273_v9, 0  ;;  %v322_v14 = vsel %vm314_vm0, %v275_v10, 0 }
  0x1e   : > { %p752_p13 = pnand %p751_p12, %p902_p4  ;;  %p759_p3 = por %p758_p2, %p757_p1 }
  0x1f   : > { %669 = vmatprep.subr.msk.bf16.mxu0 %vm314_vm0, %v274_v11  ;;  %672 = vmatprep.subr.msk.bf16.mxu1 %vm314_vm0, %v276_v12 }
  0x20   : > { %328 = vmatpush1.bf16.msra.mxu0 %v316_v13  ;;  %381 = vmatpush1.bf16.msra.mxu1 %v322_v14  ;;  %v263_v14 = vld [vmem:[%s1001_s3] sm:$0xf]  ;;  %p753_p0 = pneg %p752_p13 }
  0x22   : > { %p760_p5 = pnand %p759_p3, %p753_p0 }
  0x23   : > { %670 = vmatmul.mubr.msk.bf16.vlgmr.msra.gmra.mrb[0].mxu0 %vm307_vm1, %v748_v16  ;;  %673 = vmatmul.mubr.msk.bf16.vlgmr.msra.gmra.mrb[0].mxu1 %vm307_vm1, %v748_v16 }
  0x24   : > { %369 = vmatprep.mubr.bf16.mxu0 %v830_v0  ;;  %422 = vmatprep.mubr.bf16.mxu1 %v830_v0 }
  0x2b   : > { %671 = vmatmul.mubr.msk.bf16.gmra.mrb[4].mxu0 %vm307_vm1, %v749_v17  ;;  %674 = vmatmul.mubr.msk.bf16.gmra.mrb[4].mxu1 %vm307_vm1, %v749_v17 }
  0x2c   : > { %498 = vmatprep.mubr.bf16.mxu0 %v830_v0  ;;  %539 = vmatprep.mubr.bf16.mxu1 %v830_v0 }
  0x90   : > { %v280_v18 = vpop.permute.xlu0 %279  ;;  %v290_v20 = vpop.permute.xlu1 %289 }
  0x94   : > { %v285_v19 = vpop.permute.xlu0 %284  ;;  %v295_v47 = vpop.permute.xlu1 %294 }
  0x98   : > { %v460_v15 = vpop.permute.xlu0 %459 }
  0xf6   : > { %v361_v21 = vpop.f32.mrb[0].mxu0  ;;  %v414_v22 = vpop.f32.mrb[0].mxu1 }
  0xf7   : > { %v362_v23 = vadd.f32 %v361_v21, %v280_v18  ;;  %v415_v24 = vadd.f32 %v414_v22, %v280_v18  ;;  %v363_v25 = vpop.f32.mrb[1].mxu0  ;;  %v416_v26 = vpop.f32.mrb[1].mxu1 }
  0xf8   : > { %v364_v27 = vadd.f32 %v363_v25, %v280_v18  ;;  %v417_v28 = vadd.f32 %v416_v26, %v280_v18  ;;  %v365_v29 = vpop.f32.mrb[2].mxu0  ;;  %v418_v30 = vpop.f32.mrb[2].mxu1 }
  0xf9   : > { %v366_v31 = vadd.f32 %v365_v29, %v285_v19  ;;  %v419_v32 = vadd.f32 %v418_v30, %v285_v19  ;;  %v367_v33 = vpop.f32.mrb[3].mxu0  ;;  %v420_v34 = vpop.f32.mrb[3].mxu1  ;;  %v433_v37 = vmax.f32 %v362_v23, 0.0  ;;  %v435_v38 = vmax.f32 %v415_v24, 0.0 }
  0xfa   : > { %v368_v35 = vadd.f32 %v367_v33, %v285_v19  ;;  %v421_v36 = vadd.f32 %v420_v34, %v285_v19  ;;  %v434_v41 = vmax.f32 %v364_v27, 0.0  ;;  %v436_v42 = vmax.f32 %v417_v28, 0.0 }
  0xfb   : > { %v437_v39 = vmax.f32 %v366_v31, 0.0  ;;  %v439_v40 = vmax.f32 %v419_v32, 0.0 }
  0xfc   : > { %v438_v43 = vmax.f32 %v368_v35, 0.0  ;;  %v440_v44 = vmax.f32 %v421_v36, 0.0 }
  0xfd   : > { %v449_v45 = vpack.c.bf16 %v437_v39, %v433_v37  ;;  %v451_v46 = vpack.c.bf16 %v439_v40, %v435_v38 }
  0xfe   : > { %v450_v48 = vpack.c.bf16 %v438_v43, %v434_v41  ;;  %v452_v49 = vpack.c.bf16 %v440_v44, %v436_v42  ;;  %v371_v50 = vpop.f32.mrb[4].mxu0  ;;  %v424_v51 = vpop.f32.mrb[4].mxu1 }
  0xff   : > { %v372_v52 = vadd.f32 %v371_v50, %v290_v20  ;;  %v425_v53 = vadd.f32 %v424_v51, %v290_v20  ;;  %v373_v54 = vpop.f32.mrb[5].mxu0  ;;  %v426_v55 = vpop.f32.mrb[5].mxu1 }
 0x100   : > { %v374_v56 = vadd.f32 %v373_v54, %v290_v20  ;;  %v427_v57 = vadd.f32 %v426_v55, %v290_v20  ;;  %v375_v58 = vpop.f32.mrb[6].mxu0  ;;  %v428_v59 = vpop.f32.mrb[6].mxu1  ;;  %466 = vmatprep.subr.bf16.mxu0 %v450_v48  ;;  %507 = vmatprep.subr.bf16.mxu1 %v452_v49 }
 0x101   : > { %v376_v60 = vadd.f32 %v375_v58, %v295_v47  ;;  %v429_v61 = vadd.f32 %v428_v59, %v295_v47  ;;  %v377_v62 = vpop.f32.mrb[7].mxu0  ;;  %v430_v63 = vpop.f32.mrb[7].mxu1  ;;  %467 = vmatpush1.bf16.msra.mxu0 %v449_v45  ;;  %508 = vmatpush1.bf16.msra.mxu1 %v451_v46  ;;  %v441_v2 = vmax.f32 %v372_v52, 0.0  ;;  %v443_v3 = vmax.f32 %v425_v53, 0.0 }
 0x102   : > { %v378_v0 = vadd.f32 %v377_v62, %v295_v47  ;;  %v431_v1 = vadd.f32 %v430_v63, %v295_v47  ;;  %v442_v6 = vmax.f32 %v374_v56, 0.0  ;;  %v444_v7 = vmax.f32 %v427_v57, 0.0 }
 0x103   : > { %v445_v4 = vmax.f32 %v376_v60, 0.0  ;;  %v447_v5 = vmax.f32 %v429_v61, 0.0 }
 0x104   : > { %v446_v8 = vmax.f32 %v378_v0, 0.0  ;;  %v448_v9 = vmax.f32 %v431_v1, 0.0 }
 0x105   : > { %v453_v10 = vpack.c.bf16 %v445_v4, %v441_v2  ;;  %v455_v11 = vpack.c.bf16 %v447_v5, %v443_v3 }
 0x106   : > { %v454_v12 = vpack.c.bf16 %v446_v8, %v442_v6  ;;  %v456_v13 = vpack.c.bf16 %v448_v9, %v444_v7 }
 0x108   : > { %468 = vmatprep.subr.bf16.mxu0 %v454_v12  ;;  %509 = vmatprep.subr.bf16.mxu1 %v456_v13 }
 0x109   : > { %469 = vmatpush1.bf16.msra.mxu0 %v453_v10  ;;  %510 = vmatpush1.bf16.msra.mxu1 %v455_v11 }
 0x10c   : > { %675 = vmatmul.mubr.msk.bf16.vlgmr.msra.gmra.mrb[8].mxu0 %vm462_vm2, %v263_v14  ;;  %676 = vmatmul.mubr.msk.bf16.vlgmr.msra.gmra.mrb[8].mxu1 %vm462_vm2, %v263_v14 }
 0x1df   : > { %v500_v16 = vpop.f32.mrb[8].mxu0  ;;  %v541_v17 = vpop.f32.mrb[8].mxu1 }
 0x1e0   : > { %v501_v18 = vadd.f32 %v500_v16, %v460_v15  ;;  %v542_v19 = vadd.f32 %v541_v17, %v460_v15  ;;  %v502_v20 = vpop.f32.mrb[9].mxu0  ;;  %v543_v21 = vpop.f32.mrb[9].mxu1 }
 0x1e1   : > { %v503_v22 = vadd.f32 %v502_v20, %v460_v15  ;;  %v544_v23 = vadd.f32 %v543_v21, %v460_v15  ;;  %v504_v24 = vpop.f32.mrb[10].mxu0  ;;  %v545_v25 = vpop.f32.mrb[10].mxu1 }
 0x1e2   : > { %v505_v26 = vpop.f32.mrb[11].mxu0  ;;  %v546_v27 = vpop.f32.mrb[11].mxu1 }
 0x1e3   : > { %v685_v28 = vpack.c.bf16 %v503_v22, %v501_v18  ;;  %v686_v29 = vpack.c.bf16 %v544_v23, %v542_v19 }
 0x1e5   : > { %564 = vst [vmem:[%s242_s16] sm:$0xff] %v685_v28  ;;  %565 = vst [vmem:[%s242_s16 + $0x8] sm:$0xff] %v686_v29 }
 0x1e6   : > { %763 = shalt.err (!%p760_p5)
}
 0x1e7   : > { %s764_s10 = scalar_lea.hbm %s951_s27, 256  ;;  %s768_s13 = scalar_lea.hbm %s1003_s5, 512 }
 0x1e8   : > { %p765_p6 = scmp.ne.s32.totalorder %s951_s27, %s764_s10  ;;  %p769_p10 = scmp.lt.u32.totalorder %s951_s27, %s1003_s5 }
 0x1e9   : > { %p770_p11 = scmp.lt.u32.totalorder %s768_s13, %s764_s10  ;;  %p772_p13 = scmp.lt.u32.totalorder %s764_s10, %s951_s27 }
 0x1ea   : > { %p766_p7 = pnand %p765_p6, %p902_p4 }
 0x1eb   : > { %p771_p12 = por %p770_p11, %p769_p10 }
 0x1ec   : > { %p767_p9 = pneg %p766_p7 }
 0x1ed   : > { %p773_p0 = por %p772_p13, %p771_p12 }
 0x1ef   : > { %p774_p1 = pnand %p773_p0, %p767_p9 }
 0x1f1   : > { %777 = shalt.err (!%p774_p1)
}
 0x1f2   : > { %688 = dma.vmem_to_hbm [thread:$0]  (%p902_p4), %s953_s17, 256, %s951_s27, %s567_s21  }
 0x1f3 PF: > { %p694_p2 = scmp.ge.s32.totalorder %s828_s23, 2  ;;  %s595_s16 = sand.u32 1, %s808_s18  }
 0x1f4   : > { %s596_s24 = scalar_lea.sflag [#allocation3], %s595_s16 }
 0x1f5   : > { %p691_p3 = pnand %p694_p2, %p909_p8 }
 0x1f7   : > { %803 = dma.done.wait (!%p691_p3), %s596_s24, 256  }
 0x1f8   : > { %805 = vsyncadd (!%p691_p3), %s596_s24, 4294967040  ;;  %s18_s23 = sadd.s32 1, %s828_s23   ;;  %s1006_s18 = smov %s812_s19 }
 0x1f9   : > { %p15_p5 = scmp.ge.s32.totalorder %s18_s23, 4   ;;  %s1007_s19 = smov %s816_s20 }
 0x1fa   : > { %s1008_s20 = smov %s915_s6  ;;  %s1009_s21 = smov %s824_s22 }
 0x1fb   : > { %s1010_s22 = smov %s1012_s26  ;;  %17 = sbr.rel (!%p15_p5) target bundleno = 4 (0x4), region = 75 }
 0x202   :  { %601 = vsyncpa [#allocation3], 1 }
 0x203   :  { %603 = vsyncpa [#allocation3 + $0x1], 1 }

</bundles_post_ra>
